<compile_context>
chip_gen: v7x
topology: tpu7x:2x2x1
jax: 0.10.0
libtpu: 0.0.40
codegen_flags: <defaults>
</compile_context>

<pallas_src>
import functools

import jax
import jax.numpy as jnp
from jax.experimental import pallas as pl
from jax.experimental.pallas import tpu as pltpu


def _round_up(x, m):
    return (x + m - 1) // m * m


def _cdiv(a, b):
    return -(-a // b)


# ----------------------------------------------------------------------------
# Kernel 1: global average pooling (F.adaptive_avg_pool2d(x, 1).flatten(1))
# Input flattened to (R, HW) = (B*C, H*W); grid = (row blocks, hw chunks).
# Accumulates into a (rows_tile, 128) f32 scratch with lane-slice VPU adds;
# the ragged HW tail is masked in-kernel (no host-side pad).
# ----------------------------------------------------------------------------
def _gap_kernel(x_ref, o_ref, acc_ref, *, hw_chunk, hw_total, inv_hw, lane_slices):
    hw = pl.program_id(1)

    @pl.when(hw == 0)
    def _():
        acc_ref[...] = jnp.zeros_like(acc_ref)

    ragged = (hw_total % hw_chunk) != 0          # static Python bool
    base = hw * hw_chunk                          # traced scalar
    part = jnp.zeros(acc_ref.shape, jnp.float32)
    for j in range(lane_slices):                  # 128-lane VPU adds (no XLU)
        blk = x_ref[:, j * 128:(j + 1) * 128].astype(jnp.float32)
        if ragged:
            col = base + j * 128 + jax.lax.broadcasted_iota(jnp.int32, blk.shape, 1)
            blk = jnp.where(col < hw_total, blk, 0.0)
        part = part + blk
    acc_ref[...] += part

    @pl.when(hw == pl.num_programs(1) - 1)
    def _():
        # Single cross-lane reduce + scale, only in the epilogue.
        o_ref[...] = (jnp.sum(acc_ref[...], axis=-1, keepdims=True)
                      * inv_hw).astype(o_ref.dtype)


def global_avg_pool(x, *, max_block_bytes=14 * 1024 * 1024):
    """x: (B, C, H, W) NCHW -> (B, C) f32 means.  Tiled accumulator GAP."""
    B, C, H, W = x.shape
    HW = H * W
    R = B * C
    x2d = x.reshape(R, HW)                       # free reshape (row-major)
    itemsize = jnp.dtype(x.dtype).itemsize

    # Sublane packing: 8 rows for 32-bit, 16 for 16-bit, 32 for 8-bit dtypes.
    row_mult = 8 * (4 // max(itemsize, 1))

    # Row tile: <=512, multiple of row_mult, and try to give the parallel
    # (rows) grid axis >= 2 blocks so v7x's second TensorCore is not idle.
    half_rows = _round_up(max(1, (R + 1) // 2), row_mult)
    rows_tile = min(512, half_rows, _round_up(R, row_mult))

    # Lane chunk: balanced 128-aligned chunks under the per-block byte budget,
    # capped at 128 lane-slices so the unrolled in-kernel add loop stays small.
    budget_lanes = max(128, (max_block_bytes // (rows_tile * itemsize)) // 128 * 128)
    budget_lanes = min(budget_lanes, 128 * 128)
    n_hw_blocks = max(1, _cdiv(HW, budget_lanes))
    hw_chunk = min(_round_up(_cdiv(HW, n_hw_blocks), 128), _round_up(HW, 128))
    n_hw_blocks = _cdiv(HW, hw_chunk)

    grid = (_cdiv(R, rows_tile), n_hw_blocks)
    kernel = functools.partial(
        _gap_kernel, hw_chunk=hw_chunk, hw_total=HW,
        inv_hw=1.0 / float(HW), lane_slices=hw_chunk // 128)

    out = pl.pallas_call(
        kernel,
        out_shape=jax.ShapeDtypeStruct((R, 1), jnp.float32),
        grid_spec=pltpu.PrefetchScalarGridSpec(
            num_scalar_prefetch=0,
            grid=grid,
            in_specs=[pl.BlockSpec((rows_tile, hw_chunk), lambda r, h: (r, h))],
            out_specs=pl.BlockSpec((rows_tile, 1), lambda r, h: (r, 0)),
            scratch_shapes=[pltpu.VMEM((rows_tile, 128), jnp.float32)],
        ),
        compiler_params=pltpu.CompilerParams(
            dimension_semantics=("parallel", "arbitrary"),
            vmem_limit_bytes=40 * 1024 * 1024,
        ),
    )(x2d)
    return out.reshape(B, C)


# ----------------------------------------------------------------------------
# Kernel 2: fusion chain, gridded over scales (one pallas_call).
#   i < n-1 : up = [img || bev] @ [Wi; Wb]_bf16 + (bi + bb)
#   i = n-1 : up = img + bev                      (nn.Identity, no eye-matmul)
#   scale 0 : fusevec = up ;  else fusevec += up
#   fusevec = DiffBlock(fusevec)  (stand-in: f + tanh(f@W1+b1)@W2 + b2)
# fusevec stays resident in the output block; per-scale bf16 weights are
# double-buffered by the BlockSpec pipeline (one scale resident at a time).
# ----------------------------------------------------------------------------
def _fuse_scale_kernel(cat_ref, wcat_ref, bcat_ref, w1_ref, b1_ref, w2_ref,
                       b2_ref, o_ref, up_ref, *, n_scales, d):
    i = pl.program_id(0)

    @pl.when(i < n_scales - 1)
    def _():
        up_ref[...] = (jnp.dot(cat_ref[0].astype(jnp.bfloat16), wcat_ref[0],
                               preferred_element_type=jnp.float32)
                       + bcat_ref[0])

    @pl.when(i == n_scales - 1)
    def _():
        c = cat_ref[0]
        up_ref[...] = c[:, :d] + c[:, d:2 * d]    # Identity up-proj: plain add

    @pl.when(i == 0)
    def _():
        o_ref[...] = up_ref[...]                  # skip zero-init + add

    @pl.when(i > 0)
    def _():
        o_ref[...] = o_ref[...] + up_ref[...]

    f = o_ref[...]
    h = jnp.tanh(jnp.dot(f.astype(jnp.bfloat16), w1_ref[0],
                         preferred_element_type=jnp.float32) + b1_ref[0])
    o_ref[...] = f + jnp.dot(h.astype(jnp.bfloat16), w2_ref[0],
                             preferred_element_type=jnp.float32) + b2_ref[0]


def fuse_chain(pooled_cats, params, dims):
    """pooled_cats[i]: (B, img_dims[i]+bev_dims[i]) f32, already [img || bev]."""
    n = len(dims)
    D = dims[-1]
    assert n >= 2, "fuse_chain expects at least two scales"
    B = pooled_cats[0].shape[0]
    K_pad = params["w_cat"].shape[1]

    cats = jnp.stack(
        [jnp.pad(c, ((0, 0), (0, K_pad - c.shape[1]))) for c in pooled_cats],
        axis=0)                                   # (n, B, K_pad) f32, tiny

    def scale_idx(i):
        return (i, 0, 0)

    def scale_idx_clamped(i):                     # last scale reuses buffer (no DMA)
        return (jnp.minimum(i, n - 2), 0, 0)

    kernel = functools.partial(_fuse_scale_kernel, n_scales=n, d=D)
    return pl.pallas_call(
        kernel,
        out_shape=jax.ShapeDtypeStruct((B, D), jnp.float32),
        grid_spec=pltpu.PrefetchScalarGridSpec(
            num_scalar_prefetch=0,
            grid=(n,),
            in_specs=[
                pl.BlockSpec((1, B, K_pad), scale_idx),          # cat activations
                pl.BlockSpec((1, K_pad, D), scale_idx_clamped),  # [Wi;Wb] bf16
                pl.BlockSpec((1, 1, D), scale_idx_clamped),      # folded bias
                pl.BlockSpec((1, D, D), scale_idx),              # DiffBlock W1
                pl.BlockSpec((1, 1, D), scale_idx),
                pl.BlockSpec((1, D, D), scale_idx),              # DiffBlock W2
                pl.BlockSpec((1, 1, D), scale_idx),
            ],
            out_specs=pl.BlockSpec((B, D), lambda i: (0, 0)),    # fusevec resident
            scratch_shapes=[pltpu.VMEM((B, D), jnp.float32)],    # up
        ),
        compiler_params=pltpu.CompilerParams(
            dimension_semantics=("arbitrary",),
        ),
    )(cats, params["w_cat"], params["b_cat"],
      params["w1"], params["b1"], params["w2"], params["b2"])


# ----------------------------------------------------------------------------
# Parameters (deterministic init in-script).  Weights are pre-stacked per
# scale, zero-padded to a common K, and stored in bf16 (biases f32).
# ----------------------------------------------------------------------------
def make_params(key, dims, img_dims, bev_dims):
    D = dims[-1]
    n = len(dims)
    assert img_dims[-1] == D and bev_dims[-1] == D, (
        "Identity up-projection requires img_dims[-1]==bev_dims[-1]==dims[-1]")
    k_list = [img_dims[i] + bev_dims[i] for i in range(n)]
    K_pad = max(k_list)

    w_cat, b_cat, w1, b1, w2, b2 = [], [], [], [], [], []
    for i in range(n):
        key, kc, kcb, k1, k1b, k2, k2b = jax.random.split(key, 7)
        if i < n - 1:
            w = 0.05 * jax.random.normal(kc, (k_list[i], D), jnp.float32)
            w_cat.append(jnp.pad(w, ((0, K_pad - k_list[i]), (0, 0))))
            b_cat.append(0.05 * jax.random.normal(kcb, (1, D), jnp.float32))
        w1.append(0.05 * jax.random.normal(k1, (D, D), jnp.float32))
        b1.append(0.05 * jax.random.normal(k1b, (1, D), jnp.float32))
        w2.append(0.05 * jax.random.normal(k2, (D, D), jnp.float32))
        b2.append(0.05 * jax.random.normal(k2b, (1, D), jnp.float32))

    return {
        "w_cat": jnp.stack(w_cat).astype(jnp.bfloat16),   # (n-1, K_pad, D)
        "b_cat": jnp.stack(b_cat),                        # (n-1, 1, D) f32
        "w1": jnp.stack(w1).astype(jnp.bfloat16),         # (n, D, D)
        "b1": jnp.stack(b1),
        "w2": jnp.stack(w2).astype(jnp.bfloat16),
        "b2": jnp.stack(b2),
    }


# ----------------------------------------------------------------------------
# Full forward (type='bev', forward direction, non-cde branch)
# ----------------------------------------------------------------------------
def fuse_block_toshallow_forward(imagemaplist, bevmaplist, params, dims):
    assert len(imagemaplist) == len(dims) == len(bevmaplist)
    pooled = []
    for img, bev in zip(imagemaplist, bevmaplist):
        # One GAP launch per scale; pooled output is already [img || bev].
        pooled.append(global_avg_pool(jnp.concatenate([img, bev], axis=1)))
    return fuse_chain(pooled, params, dims)


# ----------------------------------------------------------------------------
# Pure-JAX reference (module semantics; weights upcast from bf16 to f32).
# ----------------------------------------------------------------------------
def _reference_forward(imagemaplist, bevmaplist, params, dims):
    n = len(dims)
    fusevec = 0.0
    for i in range(n):
        img_v = jnp.mean(imagemaplist[i], axis=(2, 3))
        bev_v = jnp.mean(bevmaplist[i], axis=(2, 3))
        if i < n - 1:
            cat = jnp.concatenate([img_v, bev_v], axis=1)
            k = cat.shape[1]
            up = cat @ params["w_cat"][i, :k].astype(jnp.float32) + params["b_cat"][i]
        else:
            up = img_v + bev_v
        f = fusevec + up
        h = jnp.tanh(f @ params["w1"][i].astype(jnp.float32) + params["b1"][i])
        fusevec = f + h @ params["w2"][i].astype(jnp.float32) + params["b2"][i]
    return fusevec


# ----------------------------------------------------------------------------
# Demo
# ----------------------------------------------------------------------------
if __name__ == "__main__":
    # Small-scale analogue of dims=[256]*3, img_dims=bev_dims=[64,128,256].
    dims = [32, 32, 32]
    img_dims = [8, 16, 32]
    bev_dims = [8, 16, 32]
    spatial = [(16, 16), (8, 8), (4, 4)]
    B = 2

    key = jax.random.PRNGKey(0)
    key, kp = jax.random.split(key)
    params = make_params(kp, dims, img_dims, bev_dims)

    imagemaplist, bevmaplist = [], []
    for i in range(len(dims)):
        key, ki, kb = jax.random.split(key, 3)
        H, W = spatial[i]
        imagemaplist.append(
            jax.random.normal(ki, (B, img_dims[i], H, W), jnp.float32))
        bevmaplist.append(
            jax.random.normal(kb, (B, bev_dims[i], H, W), jnp.float32))

    # Exercise multi-chunk HW accumulation, the in-kernel ragged-lane mask and
    # the ragged-rows (dropped OOB write) path of the GAP kernel.
    key, kx = jax.random.split(key)
    xbig = jax.random.normal(kx, (B, 23, 40, 40), jnp.float32)
    gap_tiled = jax.block_until_ready(
        global_avg_pool(xbig, max_block_bytes=128 * 1024))
    gap_ref = jnp.mean(xbig, axis=(2, 3))
    assert gap_tiled.shape == gap_ref.shape
    assert jnp.allclose(gap_tiled, gap_ref, atol=1e-5, rtol=1e-4), "GAP mismatch"

    out = fuse_block_toshallow_forward(imagemaplist, bevmaplist, params, dims)
    out = jax.block_until_ready(out)
    assert out.shape == (B, dims[-1]) and out.dtype == jnp.float32
    assert bool(jnp.all(jnp.isfinite(out)))

    ref = _reference_forward(imagemaplist, bevmaplist, params, dims)
    assert jnp.allclose(out, ref, atol=1e-2, rtol=1e-2), "fusion chain mismatch"

    print("KERNEL_OK")
</pallas_src>

<mosaic_0001>
module attributes {stable_mosaic.version = 11 : i64} {
  func.func @_gap_kernel(%arg0: i32, %arg1: i32, %arg2: memref<24x896xf32, #tpu.memory_space<vmem>>, %arg3: memref<24x1xf32, #tpu.memory_space<vmem>>, %arg4: memref<24x128xf32, #tpu.memory_space<vmem>>) attributes {dimension_semantics = [#tpu.dimension_semantics<parallel>, #tpu.dimension_semantics<arbitrary>], iteration_bounds = array<i64: 2, 2>, scalar_prefetch = 0 : i64, scratch_operands = 1 : i64, tpu.core_type = #tpu.core_type<tc>, window_params = [{transform_indices = @transform_0, window_bounds = array<i64: 24, 896>}, {transform_indices = @transform_1, window_bounds = array<i64: 24, 1>}]} {
    %c0_i32 = arith.constant 0 : i32
    %0 = arith.cmpi eq, %arg1, %c0_i32 : i32
    %1 = arith.extui %0 : i1 to i32
    %c0_i32_0 = arith.constant 0 : i32
    %2 = arith.cmpi ne, %1, %c0_i32_0 : i32
    scf.if %2 {
      %cst_27 = arith.constant 0.000000e+00 : f32
      %81 = vector.broadcast %cst_27 : f32 to vector<24x128xf32>
      %c0_28 = arith.constant 0 : index
      %c0_29 = arith.constant 0 : index
      %82 = vector.load %arg4[%c0_28, %c0_29] : memref<24x128xf32, #tpu.memory_space<vmem>>, vector<24x128xf32>
      tpu.vector_store %arg4[%c0_28, %c0_29], %81 {strides = array<i32>} : memref<24x128xf32, #tpu.memory_space<vmem>>, vector<24x128xf32>,
    } else {
    }
    %c896_i32 = arith.constant 896 : i32
    %3 = arith.muli %arg1, %c896_i32 : i32
    %cst = arith.constant 0.000000e+00 : f32
    %4 = vector.broadcast %cst : f32 to vector<24x128xf32>
    %c0 = arith.constant 0 : index
    %c0_1 = arith.constant 0 : index
    %5 = vector.load %arg2[%c0, %c0_1] : memref<24x896xf32, #tpu.memory_space<vmem>>, vector<24x128xf32>
    %c0_i32_2 = arith.constant 0 : i32
    %6 = arith.addi %3, %c0_i32_2 : i32
    %7 = tpu.iota {dimensions = array<i32: 1>} : vector<24x128xi32>
    %8 = vector.broadcast %6 : i32 to vector<24x128xi32>
    %9 = arith.addi %8, %7 : vector<24x128xi32>
    %c1600_i32 = arith.constant 1600 : i32
    %10 = vector.broadcast %c1600_i32 : i32 to vector<24x128xi32>
    %11 = arith.cmpi slt, %9, %10 : vector<24x128xi32>
    %cst_3 = arith.constant 0.000000e+00 : f32
    %12 = vector.broadcast %cst_3 : f32 to vector<24x128xf32>
    %13 = arith.select %11, %5, %12 : vector<24x128xi1>, vector<24x128xf32>
    %14 = arith.addf %4, %13 : vector<24x128xf32>
    %c0_4 = arith.constant 0 : index
    %c128 = arith.constant 128 : index
    %15 = vector.load %arg2[%c0_4, %c128] : memref<24x896xf32, #tpu.memory_space<vmem>>, vector<24x128xf32>
    %c128_i32 = arith.constant 128 : i32
    %16 = arith.addi %3, %c128_i32 : i32
    %17 = tpu.iota {dimensions = array<i32: 1>} : vector<24x128xi32>
    %18 = vector.broadcast %16 : i32 to vector<24x128xi32>
    %19 = arith.addi %18, %17 : vector<24x128xi32>
    %c1600_i32_5 = arith.constant 1600 : i32
    %20 = vector.broadcast %c1600_i32_5 : i32 to vector<24x128xi32>
    %21 = arith.cmpi slt, %19, %20 : vector<24x128xi32>
    %cst_6 = arith.constant 0.000000e+00 : f32
    %22 = vector.broadcast %cst_6 : f32 to vector<24x128xf32>
    %23 = arith.select %21, %15, %22 : vector<24x128xi1>, vector<24x128xf32>
    %24 = arith.addf %14, %23 : vector<24x128xf32>
    %c0_7 = arith.constant 0 : index
    %c256 = arith.constant 256 : index
    %25 = vector.load %arg2[%c0_7, %c256] : memref<24x896xf32, #tpu.memory_space<vmem>>, vector<24x128xf32>
    %c256_i32 = arith.constant 256 : i32
    %26 = arith.addi %3, %c256_i32 : i32
    %27 = tpu.iota {dimensions = array<i32: 1>} : vector<24x128xi32>
    %28 = vector.broadcast %26 : i32 to vector<24x128xi32>
    %29 = arith.addi %28, %27 : vector<24x128xi32>
    %c1600_i32_8 = arith.constant 1600 : i32
    %30 = vector.broadcast %c1600_i32_8 : i32 to vector<24x128xi32>
    %31 = arith.cmpi slt, %29, %30 : vector<24x128xi32>
    %cst_9 = arith.constant 0.000000e+00 : f32
    %32 = vector.broadcast %cst_9 : f32 to vector<24x128xf32>
    %33 = arith.select %31, %25, %32 : vector<24x128xi1>, vector<24x128xf32>
    %34 = arith.addf %24, %33 : vector<24x128xf32>
    %c0_10 = arith.constant 0 : index
    %c384 = arith.constant 384 : index
    %35 = vector.load %arg2[%c0_10, %c384] : memref<24x896xf32, #tpu.memory_space<vmem>>, vector<24x128xf32>
    %c384_i32 = arith.constant 384 : i32
    %36 = arith.addi %3, %c384_i32 : i32
    %37 = tpu.iota {dimensions = array<i32: 1>} : vector<24x128xi32>
    %38 = vector.broadcast %36 : i32 to vector<24x128xi32>
    %39 = arith.addi %38, %37 : vector<24x128xi32>
    %c1600_i32_11 = arith.constant 1600 : i32
    %40 = vector.broadcast %c1600_i32_11 : i32 to vector<24x128xi32>
    %41 = arith.cmpi slt, %39, %40 : vector<24x128xi32>
    %cst_12 = arith.constant 0.000000e+00 : f32
    %42 = vector.broadcast %cst_12 : f32 to vector<24x128xf32>
    %43 = arith.select %41, %35, %42 : vector<24x128xi1>, vector<24x128xf32>
    %44 = arith.addf %34, %43 : vector<24x128xf32>
    %c0_13 = arith.constant 0 : index
    %c512 = arith.constant 512 : index
    %45 = vector.load %arg2[%c0_13, %c512] : memref<24x896xf32, #tpu.memory_space<vmem>>, vector<24x128xf32>
    %c512_i32 = arith.constant 512 : i32
    %46 = arith.addi %3, %c512_i32 : i32
    %47 = tpu.iota {dimensions = array<i32: 1>} : vector<24x128xi32>
    %48 = vector.broadcast %46 : i32 to vector<24x128xi32>
    %49 = arith.addi %48, %47 : vector<24x128xi32>
    %c1600_i32_14 = arith.constant 1600 : i32
    %50 = vector.broadcast %c1600_i32_14 : i32 to vector<24x128xi32>
    %51 = arith.cmpi slt, %49, %50 : vector<24x128xi32>
    %cst_15 = arith.constant 0.000000e+00 : f32
    %52 = vector.broadcast %cst_15 : f32 to vector<24x128xf32>
    %53 = arith.select %51, %45, %52 : vector<24x128xi1>, vector<24x128xf32>
    %54 = arith.addf %44, %53 : vector<24x128xf32>
    %c0_16 = arith.constant 0 : index
    %c640 = arith.constant 640 : index
    %55 = vector.load %arg2[%c0_16, %c640] : memref<24x896xf32, #tpu.memory_space<vmem>>, vector<24x128xf32>
    %c640_i32 = arith.constant 640 : i32
    %56 = arith.addi %3, %c640_i32 : i32
    %57 = tpu.iota {dimensions = array<i32: 1>} : vector<24x128xi32>
    %58 = vector.broadcast %56 : i32 to vector<24x128xi32>
    %59 = arith.addi %58, %57 : vector<24x128xi32>
    %c1600_i32_17 = arith.constant 1600 : i32
    %60 = vector.broadcast %c1600_i32_17 : i32 to vector<24x128xi32>
    %61 = arith.cmpi slt, %59, %60 : vector<24x128xi32>
    %cst_18 = arith.constant 0.000000e+00 : f32
    %62 = vector.broadcast %cst_18 : f32 to vector<24x128xf32>
    %63 = arith.select %61, %55, %62 : vector<24x128xi1>, vector<24x128xf32>
    %64 = arith.addf %54, %63 : vector<24x128xf32>
    %c0_19 = arith.constant 0 : index
    %c768 = arith.constant 768 : index
    %65 = vector.load %arg2[%c0_19, %c768] : memref<24x896xf32, #tpu.memory_space<vmem>>, vector<24x128xf32>
    %c768_i32 = arith.constant 768 : i32
    %66 = arith.addi %3, %c768_i32 : i32
    %67 = tpu.iota {dimensions = array<i32: 1>} : vector<24x128xi32>
    %68 = vector.broadcast %66 : i32 to vector<24x128xi32>
    %69 = arith.addi %68, %67 : vector<24x128xi32>
    %c1600_i32_20 = arith.constant 1600 : i32
    %70 = vector.broadcast %c1600_i32_20 : i32 to vector<24x128xi32>
    %71 = arith.cmpi slt, %69, %70 : vector<24x128xi32>
    %cst_21 = arith.constant 0.000000e+00 : f32
    %72 = vector.broadcast %cst_21 : f32 to vector<24x128xf32>
    %73 = arith.select %71, %65, %72 : vector<24x128xi1>, vector<24x128xf32>
    %74 = arith.addf %64, %73 : vector<24x128xf32>
    %c0_22 = arith.constant 0 : index
    %c0_23 = arith.constant 0 : index
    %75 = vector.load %arg4[%c0_22, %c0_23] : memref<24x128xf32, #tpu.memory_space<vmem>>, vector<24x128xf32>
    %76 = arith.addf %75, %74 : vector<24x128xf32>
    %c0_24 = arith.constant 0 : index
    %c0_25 = arith.constant 0 : index
    %77 = vector.load %arg4[%c0_24, %c0_25] : memref<24x128xf32, #tpu.memory_space<vmem>>, vector<24x128xf32>
    tpu.vector_store %arg4[%c0_24, %c0_25], %76 {strides = array<i32>} : memref<24x128xf32, #tpu.memory_space<vmem>>, vector<24x128xf32>,
    %c1_i32 = arith.constant 1 : i32
    %78 = arith.cmpi eq, %arg1, %c1_i32 : i32
    %79 = arith.extui %78 : i1 to i32
    %c0_i32_26 = arith.constant 0 : i32
    %80 = arith.cmpi ne, %79, %c0_i32_26 : i32
    scf.if %80 {
      %c0_27 = arith.constant 0 : index
      %c0_28 = arith.constant 0 : index
      %81 = vector.load %arg4[%c0_27, %c0_28] : memref<24x128xf32, #tpu.memory_space<vmem>>, vector<24x128xf32>
      %cst_29 = arith.constant dense<0.000000e+00> : vector<24xf32>
      %82 = vector.multi_reduction <add>, %81, %cst_29 [1] : vector<24x128xf32> to vector<24xf32>
      %83 = vector.shape_cast %82 : vector<24xf32> to vector<24x1xf32>
      %cst_30 = arith.constant 6.250000e-04 : f32
      %84 = vector.broadcast %cst_30 : f32 to vector<24x1xf32>
      %85 = arith.mulf %83, %84 : vector<24x1xf32>
      %c0_31 = arith.constant 0 : index
      %c0_32 = arith.constant 0 : index
      %86 = vector.load %arg3[%c0_31, %c0_32] : memref<24x1xf32, #tpu.memory_space<vmem>>, vector<24x1xf32>
      tpu.vector_store %arg3[%c0_31, %c0_32], %85 {strides = array<i32>} : memref<24x1xf32, #tpu.memory_space<vmem>>, vector<24x1xf32>,
    } else {
    }
    return
  }
  func.func @transform_0(%arg0: i32, %arg1: i32) -> (i32, i32) {
    %c0_i32 = arith.constant 0 : i32
    return %arg0, %arg1 : i32, i32
  }
  func.func @transform_1(%arg0: i32, %arg1: i32) -> (i32, i32) {
    %c0_i32 = arith.constant 0 : i32
    %c0_i32_0 = arith.constant 0 : i32
    return %arg0, %c0_i32 : i32, i32
  }
}

</mosaic_0001>

<bundles_post_ra>
// kernel: tpu_custom_call.1
= control target key start
LH: loop header
LB: loop body
LE: loop exit
PB: predicated region body
PF: predicated region fallthrough
CT: control target
= control target key end

     0   :  { %6 = vsyncpa [#allocation4], 0  ;;  %s774_s0 = inlined_call_operand.hbm [shape: f32[46,1600], index: 0, kind: input, shape index: {}]   ;;  %s775_s1 = inlined_call_operand.vmem [shape: f32[46,1], index: 1, kind: output, shape index: {}]  }
   0x1   :  { %8 = vsyncpa [#allocation4 + $0x1], 0  ;;  %s576_s6 = smov 0   ;;  %s578_s7 = smov 0  }
   0x2   :  { %s580_s8 = smov 0   ;;  %s582_s9 = smov 0  }
   0x3   :  { %s584_s10 = smov 0   ;;  %s586_s11 = smov 0  }
   0x4   :  { %s588_s12 = smov 0   ;;  %s590_s13 = smov 0  }
   0x5 LB: > { %s23_s14 = sadd.s32 1, %s552_s11  ;;  %s26_s15 = sadd.s32 1, %s556_s12  ;;  %s560_s13 = sphi %s590_s13, %s14_s13   ;;  %s556_s12 = sphi %s588_s12, %s783_s12   ;;  %s552_s11 = sphi %s586_s11, %s782_s11   ;;  %s548_s10 = sphi %s584_s10, %s781_s10   ;;  %s544_s9 = sphi %s582_s9, %s780_s9   ;;  %s540_s8 = sphi %s580_s8, %s779_s8   ;;  %s536_s7 = sphi %s578_s7, %s778_s7   ;;  %s532_s6 = sphi %s576_s6, %s777_s6  }
   0x6   : > { %p24_p0 = scmp.ge.s32.totalorder %s23_s14, 2  ;;  %s379_s16 = sadd.s32 4294967295, %s560_s13  }
   0x7   : > { %p42_p1 = scmp.ne.s32.totalorder %s540_s8, %s536_s7  ;;  %p43_p2 = scmp.eq.s32.totalorder %s560_s13, 0 }
   0x8   : > { %s785_s14 = smov (%p24_p0, %s23_s14), 0  ;;  %s787_s15 = smov (!%p24_p0, %s26_s15), %s556_s12 }
   0x9   : > { %s31_s17 = ssub.s32 %s552_s11, %s785_s14  ;;  %p28_p3 = scmp.ge.s32.totalorder %s787_s15, 2 }
   0xa   : > { %p48_p4 = scmp.ne.s32.totalorder %s536_s7, %s532_s6  ;;  %p44_p5 = por %p43_p2, %p42_p1 }
   0xb   : > { %p49_p6 = scmp.eq.s32.totalorder %s379_s16, 0  ;;  %s789_s15 = smov (%p28_p3, %s787_s15), 0 }
   0xc   : > { %s30_s19 = ssub.s32 %s556_s12, %s789_s15  ;;  %s35_s21 = sadd.s32 1, %s540_s8 }
   0xd   : > { %p628_p7 = por %p49_p6, %p48_p4  ;;  %s32_s20 = sor.u32 %s31_s17, %s30_s19 }
   0xe   : > { %p33_p8 = scmp.eq.s32.totalorder %s32_s20, 0  ;;  %p382_p9 = scmp.ge.s32.totalorder %s560_s13, 4 }
  0x10   : > { %s636_s22 = scalar_select %p33_p8, %s540_s8, %s35_s21  }
  0x11   : > { %94 = sbr.rel (%p382_p9) target bundleno = 62 (0x3e), region = 16 }
  0x18   : > { %97 = sbr.rel (!%p44_p5) target bundleno = 62 (0x3e), region = 20  ;;  %s98_s23 = sand.u32 (%p44_p5), 1, %s540_s8  }
  0x19   : > { %s394_s24 = smul.u32 (%p44_p5), 168, %s98_s23  ;;  %s647_s29 = scalar_lea.sflag (%p44_p5), [#allocation4], %s98_s23 }
  0x1a   : > { %s104_s25 = smul.u32 (%p44_p5), 7, %s552_s11 }
  0x1b   : > { %s102_s30 = scalar_lea.vmem (%p44_p5), [#allocation3], %s394_s24 }
  0x1c   : > { %s105_s26 = ssub.s32 (%p44_p5), 13, %s104_s25 }
  0x1d   : > { %p106_p10 = scmp.lt.s32.totalorder (%p44_p5), %s105_s26, 7 }
  0x1f   : > { %s791_s26 = smov (!%p106_p10, %s105_s26), 7 }
  0x20   : > { %s644_s27 = smul.u32 384, %s791_s26 }
  0x22   : > { %s110_s28 = ssub.s32 2688, %s644_s27 }
  0x23   : > { %111 = vsyncadd %s647_s29, %s110_s28  ;;  %p383_p11 = scmp.ne.s32.totalorder %s644_s27, 0  ;;  %s398_s2 = smul.u32 39, %s556_s12 }
  0x24   : > { %s385_s3 = sshll.u32 %s791_s26, 3  ;;  %s119_s4 = sshll.u32 %s102_s30, 4  ;;  %s653_s4 = int_to_ptr.vmem [resolvable:$true] %s119_s4 }
  0x25   : > { %s114_s5 = sadd.s32 %s398_s2, %s104_s25  ;;  %s470_s24 = scalar_lea.hbm %s774_s0, 9984 }
  0x26   : > { %s384_s6 = sshll.u32 %s114_s5, 7 }
  0x27   : > { %s658_s19 = scalar_lea.hbm %s774_s0, %s384_s6 }
  0x28   : > { %s466_s20 = scalar_lea.hbm %s658_s19, %s644_s27  ;;  %p471_p1 = scmp.lt.u32.totalorder %s658_s19, %s774_s0 }
  0x29   : > { %p467_p12 = scmp.ne.s32.totalorder %s658_s19, %s466_s20  ;;  %p472_p2 = scmp.lt.u32.totalorder %s470_s24, %s466_s20 }
  0x2a   : > { %p474_p4 = scmp.lt.u32.totalorder %s466_s20, %s658_s19 }
  0x2b   : > { %p468_p13 = pnand %p467_p12, %p383_p11  ;;  %p473_p3 = por %p472_p2, %p471_p1 }
  0x2d   : > { %p469_p0 = pneg %p468_p13  ;;  %p475_p5 = por %p474_p4, %p473_p3 }
  0x2f   : > { %p476_p6 = pnand %p475_p5, %p469_p0 }
  0x31   : > { %479 = shalt.err (!%p476_p6)
}
  0x32   : > { %s480_s30 = scalar_lea.vmem %s653_s4, %s644_s27  ;;  %s562_s2 = smov [#allocation3]  }
  0x33   : > { %p481_p8 = scmp.ne.s32.totalorder %s653_s4, %s480_s30  ;;  %s484_s5 = sshll.u32 %s562_s2, 4  ;;  %s485_s5 = int_to_ptr.vmem [resolvable:$false] %s484_s5 }
  0x34   : > { %s486_s6 = scalar_lea.vmem %s485_s5, 5376  ;;  %p487_p12 = scmp.lt.s32.totalorder %s653_s4, %s485_s5 }
  0x35   : > { %p482_p9 = pnand %p481_p8, %p383_p11  ;;  %p488_p13 = scmp.lt.s32.totalorder %s486_s6, %s480_s30 }
  0x37   : > { %p483_p10 = pneg %p482_p9  ;;  %p489_p1 = por %p488_p13, %p487_p12 }
  0x39   : > { %p490_p2 = pnand %p489_p1, %p483_p10 }
  0x3b   : > { %493 = shalt.err (!%p490_p2)
}
  0x3c   : > { %s563_s16 = smov 1664   ;;  %s564_s17 = smov 896  }
  0x3d   : > { %125 = dma.hbm_to_vmem [thread:$0]  (%p383_p11), %s658_s19, %s644_s27, %s653_s4, %s647_s29, %s563_s16, %s564_s17, %s385_s3  }
  0x3e PF: > { %p388_p0 = scmp.ge.s32.totalorder %s560_s13, 1  ;;  %p127_p3 = scmp.lt.s32.totalorder %s560_s13, 5 }
  0x40   : > { %p128_p4 = pnand %p388_p0, %p127_p3 }
  0x41   : > { %s133_s20 = sand.u32 (!%p128_p4), 1, %s536_s7  }
  0x42   : > { %131 = sbr.rel (%p128_p4) target bundleno = 263 (0x107), region = 24  ;;  %s134_s23 = scalar_lea.sflag (!%p128_p4), [#allocation4], %s133_s20 }
  0x43   : > { %s396_s21 = smul.u32 (!%p128_p4), 168, %s133_s20 }
  0x45   : > { %s690_s24 = scalar_lea.vmem (!%p128_p4), [#allocation3], %s396_s21 }
  0x49   : > { %527 = dma.done.wait (%p628_p7), %s134_s23, 2688  }
  0x4a   : > { %529 = vsyncadd (%p628_p7), %s134_s23, 4294964608  ;;  %s162_s26 = smul.u32 3, %s548_s10  ;;  %p390_p5 = scmp.ne.s32.totalorder %s544_s9, 0 }
  0x4b   : > { %v565_v0 = vmov (!%p390_p5), 0.0  }
  0x4c   : > { %p163_p11 = scmp.lt.s32.totalorder %s162_s26, 5  ;;  %171 = sbr.rel (%p390_p5) target bundleno = 83 (0x53), region = 32  ;;  %172 = vst [vmem:[#allocation2] sm:$0xff] (!%p390_p5), %v565_v0  ;;  %173 = vst [vmem:[#allocation2 + $0x8] sm:$0xff] (!%p390_p5), %v565_v0 }
  0x4d   : > { %174 = vst [vmem:[#allocation2 + $0x10] sm:$0xff] (!%p390_p5), %v565_v0 }
  0x4e   : > { %s793_s26 = smov (!%p163_p11, %s162_s26), 5 }
  0x4f   : > { %s389_s27 = sshll.u32 %s793_s26, 3 }
  0x50   : > { %s700_s4 = scalar_lea.vmem %s775_s1, %s389_s27 }
  0x53 PF: > { %s175_s10 = smul.u32 896, %s544_s9  ;;  %v179_v1 = vlaneseq  ;;  %v176_v6 = vld [vmem:[%s690_s24] sm:$0xff]  ;;  %v190_v8 = vld [vmem:[%s690_s24 + $0x8] sm:$0xff]  ;;  %v203_v10 = vld [vmem:[%s690_s24 + $0x10] sm:$0xff]  ;;  %p391_p7 = scmp.ne.s32.totalorder %s544_s9, 1 }
  0x54   : > { %v216_v17 = vld [vmem:[%s690_s24 + $0x18] sm:$0xff]  ;;  %v191_v20 = vld [vmem:[%s690_s24 + $0x40] sm:$0xff]  ;;  %v204_v24 = vld [vmem:[%s690_s24 + $0x48] sm:$0xff]  ;;  %vm293_vm7 = vcmask (!%p391_p7), 7168  }
  0x55   : > { %v180_v2 = vand.u32 127, %v179_v1  ;;  %v181_v3 = vstv %s175_s10  ;;  %s193_s18 = sadd.s32 128, %s175_s10  ;;  %s206_s19 = sadd.s32 256, %s175_s10  ;;  %v177_v19 = vld [vmem:[%s690_s24 + $0x38] sm:$0xff]  ;;  %v229_v26 = vld [vmem:[%s690_s24 + $0x20] sm:$0xff]  ;;  %v217_v28 = vld [vmem:[%s690_s24 + $0x50] sm:$0xff] }
  0x56   : > { %v194_v4 = vstv %s193_s18  ;;  %v207_v5 = vstv %s206_s19  ;;  %s219_s25 = sadd.s32 384, %s175_s10  ;;  %s232_s28 = sadd.s32 512, %s175_s10  ;;  %v242_v30 = vld [vmem:[%s690_s24 + $0x28] sm:$0xff]  ;;  %v230_v34 = vld [vmem:[%s690_s24 + $0x58] sm:$0xff] }
  0x57   : > { %v182_v7 = vadd.s32 %v181_v3, %v180_v2  ;;  %v195_v9 = vadd.s32 %v194_v4, %v180_v2  ;;  %v208_v11 = vadd.s32 %v207_v5, %v180_v2  ;;  %v220_v12 = vstv %s219_s25  ;;  %s245_s30 = sadd.s32 640, %s175_s10  ;;  %s258_s2 = sadd.s32 768, %s175_s10  ;;  %v178_v38 = vld [vmem:[%s690_s24 + $0x70] sm:$0xff]  ;;  %v192_v39 = vld [vmem:[%s690_s24 + $0x78] sm:$0xff]  ;;  %v205_v40 = vld [vmem:[%s690_s24 + $0x80] sm:$0xff] }
  0x58   : > { %v221_v13 = vadd.s32 %v220_v12, %v180_v2  ;;  %v233_v14 = vstv %s232_s28  ;;  %v246_v15 = vstv %s245_s30  ;;  %v259_v16 = vstv %s258_s2  ;;  %v255_v45 = vld [vmem:[%s690_s24 + $0x30] sm:$0xff]  ;;  %v268_v1 = vld [vmem:[#allocation2] sm:$0xff] }
  0x59   : > { %vm183_vm0 = vcmp.lt.s32.totalorder %v182_v7, 1600  ;;  %vm196_vm1 = vcmp.lt.s32.totalorder %v195_v9, 1600  ;;  %vm209_vm2 = vcmp.lt.s32.totalorder %v208_v11, 1600  ;;  %v234_v18 = vadd.s32 %v233_v14, %v180_v2  ;;  %v243_v47 = vld [vmem:[%s690_s24 + $0x60] sm:$0xff]  ;;  %v218_v48 = vld [vmem:[%s690_s24 + $0x88] sm:$0xff]  ;;  %v231_v57 = vld [vmem:[%s690_s24 + $0x90] sm:$0xff] }
  0x5a   : > { %v184_v21 = vsel %vm183_vm0, %v176_v6, 0.0  ;;  %v197_v22 = vsel %vm196_vm1, %v190_v8, 0.0  ;;  %v210_v23 = vsel %vm209_vm2, %v203_v10, 0.0  ;;  %vm222_vm3 = vcmp.lt.s32.totalorder %v221_v13, 1600  ;;  %v256_v55 = vld [vmem:[%s690_s24 + $0x68] sm:$0xff]  ;;  %v244_v0 = vld [vmem:[%s690_s24 + $0x98] sm:$0xff] }
  0x5b   : > { %v200_v25 = vadd.f32 %v197_v22, %v184_v21  ;;  %vm235_vm4 = vcmp.lt.s32.totalorder %v234_v18, 1600  ;;  %v247_v27 = vadd.s32 %v246_v15, %v180_v2  ;;  %v223_v29 = vsel %vm222_vm3, %v216_v17, 0.0  ;;  %v257_v7 = vld [vmem:[%s690_s24 + $0xa0] sm:$0xff]  ;;  %v269_v8 = vld [vmem:[#allocation2 + $0x8] sm:$0xff] }
  0x5c   : > { %v260_v31 = vadd.s32 %v259_v16, %v180_v2  ;;  %v185_v32 = vsel %vm183_vm0, %v177_v19, 0.0  ;;  %v198_v33 = vsel %vm196_vm1, %v191_v20, 0.0  ;;  %v211_v37 = vsel %vm209_vm2, %v204_v24, 0.0  ;;  %v270_v16 = vld [vmem:[#allocation2 + $0x10] sm:$0xff] }
  0x5d   : > { %v213_v35 = vadd.f32 %v210_v23, %v200_v25  ;;  %vm248_vm5 = vcmp.lt.s32.totalorder %v247_v27, 1600  ;;  %v201_v36 = vadd.f32 %v198_v33, %v185_v32  ;;  %v236_v41 = vsel %vm235_vm4, %v229_v26, 0.0 }
  0x5e   : > { %v224_v42 = vsel %vm222_vm3, %v217_v28, 0.0  ;;  %v249_v44 = vsel %vm248_vm5, %v242_v30, 0.0  ;;  %vm261_vm6 = vcmp.lt.s32.totalorder %v260_v31, 1600  ;;  %v237_v49 = vsel %vm235_vm4, %v230_v34, 0.0 }
  0x5f   : > { %v226_v43 = vadd.f32 %v223_v29, %v213_v35  ;;  %v214_v46 = vadd.f32 %v211_v37, %v201_v36  ;;  %v186_v50 = vsel %vm183_vm0, %v178_v38, 0.0  ;;  %v199_v51 = vsel %vm196_vm1, %v192_v39, 0.0 }
  0x60   : > { %v212_v52 = vsel %vm209_vm2, %v205_v40, 0.0  ;;  %v202_v56 = vadd.f32 %v199_v51, %v186_v50  ;;  %v262_v58 = vsel %vm261_vm6, %v255_v45, 0.0  ;;  %v250_v59 = vsel %vm248_vm5, %v243_v47, 0.0 }
  0x61   : > { %v239_v53 = vadd.f32 %v236_v41, %v226_v43  ;;  %v227_v54 = vadd.f32 %v224_v42, %v214_v46  ;;  %v225_v60 = vsel %vm222_vm3, %v218_v48, 0.0  ;;  %v263_v2 = vsel %vm261_vm6, %v256_v55, 0.0 }
  0x62   : > { %v215_v63 = vadd.f32 %v212_v52, %v202_v56  ;;  %v238_v3 = vsel %vm235_vm4, %v231_v57, 0.0  ;;  %v251_v9 = vsel %vm248_vm5, %v244_v0, 0.0  ;;  %v264_v13 = vsel %vm261_vm6, %v257_v7, 0.0 }
  0x63   : > { %v252_v61 = vadd.f32 %v249_v44, %v239_v53  ;;  %v240_v62 = vadd.f32 %v237_v49, %v227_v54 }
  0x64   : > { %v228_v6 = vadd.f32 %v225_v60, %v215_v63 }
  0x65   : > { %v265_v4 = vadd.f32 %v262_v58, %v252_v61  ;;  %v253_v5 = vadd.f32 %v250_v59, %v240_v62 }
  0x66   : > { %v241_v12 = vadd.f32 %v238_v3, %v228_v6 }
  0x67   : > { %v271_v10 = vadd.f32 %v268_v1, %v265_v4  ;;  %v266_v11 = vadd.f32 %v263_v2, %v253_v5 }
  0x68   : > { %v254_v15 = vadd.f32 %v251_v9, %v241_v12  ;;  %280 = sbr.rel (%p391_p7) target bundleno = 263 (0x107), region = 36 }
  0x69   : > { %274 = vst [vmem:[#allocation2] sm:$0xff] %v271_v10  ;;  %v272_v14 = vadd.f32 %v269_v8, %v266_v11 }
  0x6a   : > { %v267_v17 = vadd.f32 %v264_v13, %v254_v15 }
  0x6b   : > { %275 = vst [vmem:[#allocation2 + $0x8] sm:$0xff] %v272_v14 }
  0x6c   : > { %v273_v18 = vadd.f32 %v270_v16, %v267_v17 }
  0x6e   : > { %276 = vst [vmem:[#allocation2 + $0x10] sm:$0xff] %v273_v18 }
  0x70   : > { %v281_v19 = vld [vmem:[#allocation2] sm:$0xff] }
  0x71   : > { %284 = vadd.xlane.f32.xlu0 %v281_v19 }
  0x72   : > { %v282_v21 = vld [vmem:[#allocation2 + $0x8] sm:$0xff] }
  0x75   : > { %v283_v20 = vld [vmem:[#allocation2 + $0x10] sm:$0xff]  ;;  %286 = vadd.xlane.f32.xlu0 %v282_v21 }
  0x76   : > { %288 = vadd.xlane.f32.xlu1 %v283_v20 }
  0xfe   : > { %v285_v22 = vpop.xlane.xlu0 %284 }
  0xff   : > { %v290_v23 = vmul.f32 0.000625, %v285_v22 }
 0x101   : > { %294 = vst.msk [vmem:[%s700_s4] sm:$0xff] %vm293_vm7, %v290_v23 }
 0x102   : > { %v287_v25 = vpop.xlane.xlu0 %286 }
 0x103   : > { %v289_v24 = vpop.xlane.xlu1 %288  ;;  %v291_v27 = vmul.f32 0.000625, %v287_v25 }
 0x104   : > { %v292_v26 = vmul.f32 0.000625, %v289_v24 }
 0x105   : > { %295 = vst.msk [vmem:[%s700_s4 + $0x8] sm:$0xff] %vm293_vm7, %v291_v27 }
 0x106   : > { %296 = vst.msk [vmem:[%s700_s4 + $0x10] sm:$0xff] %vm293_vm7, %v292_v26 }
 0x107 PF: > { %s14_s13 = sadd.s32 1, %s560_s13   ;;  %s777_s6 = smov %s536_s7 }
 0x108   : > { %p11_p6 = scmp.ge.s32.totalorder %s14_s13, 6   ;;  %s778_s7 = smov %s540_s8 }
 0x109   : > { %s779_s8 = smov %s636_s22  ;;  %s780_s9 = smov %s552_s11 }
 0x10a   : > { %s781_s10 = smov %s556_s12  ;;  %s782_s11 = smov %s785_s14 }
 0x10b   : > { %s783_s12 = smov %s789_s15  ;;  %13 = sbr.rel (!%p11_p6) target bundleno = 5 (0x5), region = 72 }
 0x112   :  { %319 = vsyncpa [#allocation4], 1 }
 0x113   :  { %321 = vsyncpa [#allocation4 + $0x1], 1 }

</bundles_post_ra>
